<compile_context>
chip_gen: v7x
topology: tpu7x:2x2x1
jax: 0.10.0
libtpu: 0.0.40
codegen_flags: <defaults>
</compile_context>

<pallas_src>
from functools import partial

import numpy as np
import jax
import jax.numpy as jnp
from jax import lax
from jax.experimental import pallas as pl
from jax.experimental.pallas import tpu as pltpu

# ---------------- hyperparameters: MS_Loss(tokend, r, dk, nb, featured, out_dim) ----
B = 2          # batch
T = 8          # tokend  (number of tokens / spatial points)
R = 2          # r       (number of attention kernels per block)
DK = 16        # dk      (attention key dim)
NB = 2         # nb      (number of blocks)
D = 32         # featured
OUT = 1        # out_dim
RDK = R * DK
LN_EPS = 1e-5


# ------------------------------- in-kernel helpers ----------------------------------
def _softmax_lastdim(s):
    m = jnp.max(s, axis=-1, keepdims=True)
    e = jnp.exp(s - m)
    return e / jnp.sum(e, axis=-1, keepdims=True)


def _layernorm2d(x, g, b):
    # nn.LayerNorm([tokend, featured]): normalize jointly over BOTH trailing dims.
    mu = jnp.mean(x, axis=-1, keepdims=True)
    mu = jnp.mean(mu, axis=-2, keepdims=True)                 # overall mean (1,1)
    xc = x - mu
    var = jnp.mean(xc * xc, axis=-1, keepdims=True)
    var = jnp.mean(var, axis=-2, keepdims=True)               # overall var  (1,1)
    return xc * lax.rsqrt(var + LN_EPS) * g + b


# ---------------------------------- fused kernel ------------------------------------
def ms_loss_kernel(xy_ref, wq_ref, bq_ref, wk_ref, bk_ref,
                   lng_ref, lnb_ref, wp_ref, bp_ref, o_ref):
    xy = xy_ref[0]                                            # (T, D) tokens for this batch elem
    inv_sqrt_dk = 1.0 / (DK ** 0.5)

    # Vinput = fcn_0(xy)
    v = _layernorm2d(xy, lng_ref[0], lnb_ref[0])

    # ---- intermediate blocks j = 0 .. NB-2 (attention applied to Vinput) ----
    for j in range(NB - 1):                                   # static unroll
        q_all = jnp.dot(v, wq_ref[j], preferred_element_type=jnp.float32) + bq_ref[j]
        k_all = jnp.dot(v, wk_ref[j], preferred_element_type=jnp.float32) + bk_ref[j]
        mid = jnp.zeros((T, D), jnp.float32)
        for i in range(R):                                    # static unroll over heads
            qi = q_all[:, i * DK:(i + 1) * DK]
            ki = k_all[:, i * DK:(i + 1) * DK]
            s = lax.dot_general(qi, ki, dimension_numbers=(((1,), (1,)), ((), ())),
                                preferred_element_type=jnp.float32) * inv_sqrt_dk
            attn = _softmax_lastdim(s)                        # (T, T)
            mid = mid + jnp.dot(attn, v, preferred_element_type=jnp.float32)
        v = _layernorm2d(mid, lng_ref[j + 1], lnb_ref[j + 1]) + v

    # ---- final block j = NB-1 (attention applied to the RAW input xy, then fcp_i) ----
    q_all = jnp.dot(v, wq_ref[NB - 1], preferred_element_type=jnp.float32) + bq_ref[NB - 1]
    k_all = jnp.dot(v, wk_ref[NB - 1], preferred_element_type=jnp.float32) + bk_ref[NB - 1]
    out = jnp.zeros((D, OUT), jnp.float32)
    for i in range(R):
        qi = q_all[:, i * DK:(i + 1) * DK]
        ki = k_all[:, i * DK:(i + 1) * DK]
        s = lax.dot_general(qi, ki, dimension_numbers=(((1,), (1,)), ((), ())),
                            preferred_element_type=jnp.float32) * inv_sqrt_dk
        attn = _softmax_lastdim(s)
        # torch: Attn[:, :tokend+out_dim, :] -- slice is a no-op (Attn only has tokend rows).
        vv = jnp.dot(attn, xy, preferred_element_type=jnp.float32)        # (T, D)
        # fcp_i applied to V.permute(0,2,1): (D,T) @ (T,OUT) == contract vv's token axis.
        out = out + lax.dot_general(vv, wp_ref[i],
                                    dimension_numbers=(((0,), (0,)), ((), ())),
                                    preferred_element_type=jnp.float32) + bp_ref[i]
    o_ref[0] = out.astype(o_ref.dtype)


# ------------------------------------- wrapper ---------------------------------------
def _resident_spec(shape):
    """Full-array block, same block index every grid step -> stays resident in VMEM."""
    nd = len(shape)
    return pl.BlockSpec(shape, lambda b, _nd=nd: (0,) * _nd)


def ms_loss_pallas(xy, params):
    """xy: (B, tokend, featured) -> (B, featured, out_dim); whole MS_Loss in one launch."""
    names = ("wq", "bq", "wk", "bk", "lng", "lnb", "wp", "bp")
    in_specs = [pl.BlockSpec((1, T, D), lambda b: (b, 0, 0))]
    args = [xy]
    for name in names:
        in_specs.append(_resident_spec(params[name].shape))
        args.append(params[name])
    return pl.pallas_call(
        ms_loss_kernel,
        out_shape=jax.ShapeDtypeStruct((B, D, OUT), jnp.float32),
        grid=(B,),
        in_specs=in_specs,
        out_specs=pl.BlockSpec((1, D, OUT), lambda b: (b, 0, 0)),
        compiler_params=pltpu.CompilerParams(dimension_semantics=("parallel",)),
    )(*args)


# --------------------------- deterministic example parameters ------------------------
def init_params(key):
    ks = jax.random.split(key, 8)

    def w(k, shape, scale=0.3):
        return (scale * jax.random.normal(k, shape)).astype(jnp.float32)

    return dict(
        # fcq_{j,i} / fck_{j,i}: Linear(featured -> dk); all r heads fused into one
        # (D, r*dk) slab per block j, blocks stacked along a leading static axis.
        wq=w(ks[0], (NB, D, RDK)), bq=w(ks[1], (NB, 1, RDK), 0.05),
        wk=w(ks[2], (NB, D, RDK)), bk=w(ks[3], (NB, 1, RDK), 0.05),
        # fcn_j: LayerNorm([tokend, featured]) affine params.  The torch module also
        # creates fcn_{nb}, which forward() never uses, so it is omitted here.
        lng=1.0 + w(ks[4], (NB, T, D), 0.05), lnb=w(ks[5], (NB, T, D), 0.05),
        # fcp_i: Linear(tokend -> out_dim), stacked over i.
        wp=w(ks[6], (R, T, OUT)), bp=w(ks[7], (R, 1, OUT), 0.05),
    )


# ------------------------------ pure-JAX reference (check) ---------------------------
def ms_loss_reference(xy, p):
    def ln(x, g, b):
        mu = jnp.mean(x, axis=(1, 2), keepdims=True)
        var = jnp.mean((x - mu) ** 2, axis=(1, 2), keepdims=True)
        return (x - mu) * lax.rsqrt(var + LN_EPS) * g + b

    scale = 1.0 / jnp.sqrt(jnp.float32(DK))
    v = ln(xy, p["lng"][0], p["lnb"][0])
    for j in range(NB - 1):
        mid = jnp.zeros_like(v)
        for i in range(R):
            q = v @ p["wq"][j, :, i * DK:(i + 1) * DK] + p["bq"][j, :, i * DK:(i + 1) * DK]
            k = v @ p["wk"][j, :, i * DK:(i + 1) * DK] + p["bk"][j, :, i * DK:(i + 1) * DK]
            attn = jax.nn.softmax(q @ jnp.swapaxes(k, 1, 2) * scale, axis=2)
            mid = mid + attn @ v
        v = ln(mid, p["lng"][j + 1], p["lnb"][j + 1]) + v
    out = jnp.zeros((xy.shape[0], D, OUT), jnp.float32)
    for i in range(R):
        q = v @ p["wq"][NB - 1, :, i * DK:(i + 1) * DK] + p["bq"][NB - 1, :, i * DK:(i + 1) * DK]
        k = v @ p["wk"][NB - 1, :, i * DK:(i + 1) * DK] + p["bk"][NB - 1, :, i * DK:(i + 1) * DK]
        attn = jax.nn.softmax(q @ jnp.swapaxes(k, 1, 2) * scale, axis=2)
        vv = attn[:, :T + OUT, :] @ xy                       # slice is a no-op; kept for fidelity
        out = out + jnp.swapaxes(vv, 1, 2) @ p["wp"][i] + p["bp"][i]
    return out


if __name__ == "__main__":
    key = jax.random.PRNGKey(0)
    k_x, k_p = jax.random.split(key)
    xy = jax.random.normal(k_x, (B, T, D), jnp.float32)       # (batch, tokend, featured)
    params = init_params(k_p)

    fwd = jax.jit(ms_loss_pallas)
    out = jax.block_until_ready(fwd(xy, params))
    assert out.shape == (B, D, OUT), out.shape
    assert out.dtype == jnp.float32

    ref = ms_loss_reference(xy, params)
    np.testing.assert_allclose(np.asarray(out), np.asarray(ref), rtol=1e-3, atol=1e-3)
    print("KERNEL_OK")
</pallas_src>

<mosaic_0001>
module attributes {stable_mosaic.version = 11 : i64} {
  func.func @ms_loss_kernel(%arg0: i32, %arg1: memref<1x8x32xf32, #tpu.memory_space<vmem>>, %arg2: memref<2x32x32xf32, #tpu.memory_space<vmem>>, %arg3: memref<2x1x32xf32, #tpu.memory_space<vmem>>, %arg4: memref<2x32x32xf32, #tpu.memory_space<vmem>>, %arg5: memref<2x1x32xf32, #tpu.memory_space<vmem>>, %arg6: memref<2x8x32xf32, #tpu.memory_space<vmem>>, %arg7: memref<2x8x32xf32, #tpu.memory_space<vmem>>, %arg8: memref<2x8x1xf32, #tpu.memory_space<vmem>>, %arg9: memref<2x1x1xf32, #tpu.memory_space<vmem>>, %arg10: memref<1x32x1xf32, #tpu.memory_space<vmem>>) attributes {dimension_semantics = [#tpu.dimension_semantics<parallel>], iteration_bounds = array<i64: 2>, scalar_prefetch = 0 : i64, scratch_operands = 0 : i64, tpu.core_type = #tpu.core_type<tc>, window_params = [{transform_indices = @transform_0, window_bounds = array<i64: 1, 8, 32>}, {pipeline_mode = #tpu.pipeline_mode<synchronous>, transform_indices = @transform_1, window_bounds = array<i64: 2, 32, 32>}, {pipeline_mode = #tpu.pipeline_mode<synchronous>, transform_indices = @transform_2, window_bounds = array<i64: 2, 1, 32>}, {pipeline_mode = #tpu.pipeline_mode<synchronous>, transform_indices = @transform_3, window_bounds = array<i64: 2, 32, 32>}, {pipeline_mode = #tpu.pipeline_mode<synchronous>, transform_indices = @transform_4, window_bounds = array<i64: 2, 1, 32>}, {pipeline_mode = #tpu.pipeline_mode<synchronous>, transform_indices = @transform_5, window_bounds = array<i64: 2, 8, 32>}, {pipeline_mode = #tpu.pipeline_mode<synchronous>, transform_indices = @transform_6, window_bounds = array<i64: 2, 8, 32>}, {pipeline_mode = #tpu.pipeline_mode<synchronous>, transform_indices = @transform_7, window_bounds = array<i64: 2, 8, 1>}, {pipeline_mode = #tpu.pipeline_mode<synchronous>, transform_indices = @transform_8, window_bounds = array<i64: 2, 1, 1>}, {transform_indices = @transform_9, window_bounds = array<i64: 1, 32, 1>}]} {
    %c0 = arith.constant 0 : index
    %c0_0 = arith.constant 0 : index
    %c0_1 = arith.constant 0 : index
    %0 = vector.load %arg1[%c0, %c0_0, %c0_1] : memref<1x8x32xf32, #tpu.memory_space<vmem>>, vector<1x8x32xf32>
    %1 = vector.shape_cast %0 : vector<1x8x32xf32> to vector<8x32xf32>
    %c0_2 = arith.constant 0 : index
    %c0_3 = arith.constant 0 : index
    %c0_4 = arith.constant 0 : index
    %2 = vector.load %arg6[%c0_2, %c0_3, %c0_4] : memref<2x8x32xf32, #tpu.memory_space<vmem>>, vector<1x8x32xf32>
    %3 = vector.shape_cast %2 : vector<1x8x32xf32> to vector<8x32xf32>
    %c0_5 = arith.constant 0 : index
    %c0_6 = arith.constant 0 : index
    %c0_7 = arith.constant 0 : index
    %4 = vector.load %arg7[%c0_5, %c0_6, %c0_7] : memref<2x8x32xf32, #tpu.memory_space<vmem>>, vector<1x8x32xf32>
    %5 = vector.shape_cast %4 : vector<1x8x32xf32> to vector<8x32xf32>
    %cst = arith.constant dense<0.000000e+00> : vector<8xf32>
    %6 = vector.multi_reduction <add>, %1, %cst [1] : vector<8x32xf32> to vector<8xf32>
    %7 = vector.shape_cast %6 : vector<8xf32> to vector<8x1xf32>
    %cst_8 = arith.constant 3.200000e+01 : f32
    %8 = vector.broadcast %cst_8 : f32 to vector<8x1xf32>
    %9 = arith.divf %7, %8 : vector<8x1xf32>
    %cst_9 = arith.constant dense<0.000000e+00> : vector<1xf32>
    %10 = vector.multi_reduction <add>, %9, %cst_9 [0] : vector<8x1xf32> to vector<1xf32>
    %11 = vector.shape_cast %10 : vector<1xf32> to vector<1x1xf32>
    %cst_10 = arith.constant 8.000000e+00 : f32
    %12 = vector.broadcast %cst_10 : f32 to vector<1x1xf32>
    %13 = arith.divf %11, %12 : vector<1x1xf32>
    %14 = vector.broadcast %13 : vector<1x1xf32> to vector<8x32xf32>
    %15 = arith.subf %1, %14 : vector<8x32xf32>
    %16 = arith.mulf %15, %15 : vector<8x32xf32>
    %cst_11 = arith.constant dense<0.000000e+00> : vector<8xf32>
    %17 = vector.multi_reduction <add>, %16, %cst_11 [1] : vector<8x32xf32> to vector<8xf32>
    %18 = vector.shape_cast %17 : vector<8xf32> to vector<8x1xf32>
    %cst_12 = arith.constant 3.200000e+01 : f32
    %19 = vector.broadcast %cst_12 : f32 to vector<8x1xf32>
    %20 = arith.divf %18, %19 : vector<8x1xf32>
    %cst_13 = arith.constant dense<0.000000e+00> : vector<1xf32>
    %21 = vector.multi_reduction <add>, %20, %cst_13 [0] : vector<8x1xf32> to vector<1xf32>
    %22 = vector.shape_cast %21 : vector<1xf32> to vector<1x1xf32>
    %cst_14 = arith.constant 8.000000e+00 : f32
    %23 = vector.broadcast %cst_14 : f32 to vector<1x1xf32>
    %24 = arith.divf %22, %23 : vector<1x1xf32>
    %cst_15 = arith.constant 9.99999974E-6 : f32
    %25 = vector.broadcast %cst_15 : f32 to vector<1x1xf32>
    %26 = arith.addf %24, %25 : vector<1x1xf32>
    %27 = math.rsqrt %26 : vector<1x1xf32>
    %28 = vector.broadcast %27 : vector<1x1xf32> to vector<8x32xf32>
    %29 = arith.mulf %15, %28 : vector<8x32xf32>
    %30 = arith.mulf %29, %3 : vector<8x32xf32>
    %31 = arith.addf %30, %5 : vector<8x32xf32>
    %c0_16 = arith.constant 0 : index
    %c0_17 = arith.constant 0 : index
    %c0_18 = arith.constant 0 : index
    %32 = vector.load %arg2[%c0_16, %c0_17, %c0_18] : memref<2x32x32xf32, #tpu.memory_space<vmem>>, vector<1x32x32xf32>
    %33 = vector.shape_cast %32 : vector<1x32x32xf32> to vector<32x32xf32>
    %cst_19 = arith.constant dense<0.000000e+00> : vector<8x32xf32>
    %34 = tpu.matmul %31, %33, %cst_19 {dimension_numbers = #tpu.dot_dimension_numbers<[1], [0], [0], [1], [0, 0, 1, 1], [], []>} : vector<8x32xf32>, vector<32x32xf32>, vector<8x32xf32> -> vector<8x32xf32>
    %c0_20 = arith.constant 0 : index
    %c0_21 = arith.constant 0 : index
    %c0_22 = arith.constant 0 : index
    %35 = vector.load %arg3[%c0_20, %c0_21, %c0_22] : memref<2x1x32xf32, #tpu.memory_space<vmem>>, vector<1x1x32xf32>
    %36 = vector.shape_cast %35 : vector<1x1x32xf32> to vector<1x32xf32>
    %37 = vector.broadcast %36 : vector<1x32xf32> to vector<8x32xf32>
    %38 = arith.addf %34, %37 : vector<8x32xf32>
    %c0_23 = arith.constant 0 : index
    %c0_24 = arith.constant 0 : index
    %c0_25 = arith.constant 0 : index
    %39 = vector.load %arg4[%c0_23, %c0_24, %c0_25] : memref<2x32x32xf32, #tpu.memory_space<vmem>>, vector<1x32x32xf32>
    %40 = vector.shape_cast %39 : vector<1x32x32xf32> to vector<32x32xf32>
    %cst_26 = arith.constant dense<0.000000e+00> : vector<8x32xf32>
    %41 = tpu.matmul %31, %40, %cst_26 {dimension_numbers = #tpu.dot_dimension_numbers<[1], [0], [0], [1], [0, 0, 1, 1], [], []>} : vector<8x32xf32>, vector<32x32xf32>, vector<8x32xf32> -> vector<8x32xf32>
    %c0_27 = arith.constant 0 : index
    %c0_28 = arith.constant 0 : index
    %c0_29 = arith.constant 0 : index
    %42 = vector.load %arg5[%c0_27, %c0_28, %c0_29] : memref<2x1x32xf32, #tpu.memory_space<vmem>>, vector<1x1x32xf32>
    %43 = vector.shape_cast %42 : vector<1x1x32xf32> to vector<1x32xf32>
    %44 = vector.broadcast %43 : vector<1x32xf32> to vector<8x32xf32>
    %45 = arith.addf %41, %44 : vector<8x32xf32>
    %cst_30 = arith.constant 0.000000e+00 : f32
    %46 = vector.broadcast %cst_30 : f32 to vector<8x32xf32>
    %47 = vector.extract_strided_slice %38 {offsets = [0, 0], sizes = [8, 16], strides = [1, 1]} : vector<8x32xf32> to vector<8x16xf32>
    %48 = vector.extract_strided_slice %45 {offsets = [0, 0], sizes = [8, 16], strides = [1, 1]} : vector<8x32xf32> to vector<8x16xf32>
    %cst_31 = arith.constant dense<0.000000e+00> : vector<8x8xf32>
    %49 = tpu.matmul %47, %48, %cst_31 {dimension_numbers = #tpu.dot_dimension_numbers<[1], [1], [0], [0], [0, 0, 1, 0], [], []>} : vector<8x16xf32>, vector<8x16xf32>, vector<8x8xf32> -> vector<8x8xf32>
    %cst_32 = arith.constant 2.500000e-01 : f32
    %50 = vector.broadcast %cst_32 : f32 to vector<8x8xf32>
    %51 = arith.mulf %49, %50 : vector<8x8xf32>
    %cst_33 = arith.constant dense<0xFF800000> : vector<8xf32>
    %52 = vector.multi_reduction <maximumf>, %51, %cst_33 [1] : vector<8x8xf32> to vector<8xf32>
    %53 = vector.shape_cast %52 : vector<8xf32> to vector<8x1xf32>
    %54 = vector.broadcast %53 : vector<8x1xf32> to vector<8x8xf32>
    %55 = arith.subf %51, %54 : vector<8x8xf32>
    %56 = math.exp %55 : vector<8x8xf32>
    %cst_34 = arith.constant dense<0.000000e+00> : vector<8xf32>
    %57 = vector.multi_reduction <add>, %56, %cst_34 [1] : vector<8x8xf32> to vector<8xf32>
    %58 = vector.shape_cast %57 : vector<8xf32> to vector<8x1xf32>
    %59 = vector.broadcast %58 : vector<8x1xf32> to vector<8x8xf32>
    %60 = arith.divf %56, %59 : vector<8x8xf32>
    %cst_35 = arith.constant dense<0.000000e+00> : vector<8x32xf32>
    %61 = tpu.matmul %60, %31, %cst_35 {dimension_numbers = #tpu.dot_dimension_numbers<[1], [0], [0], [1], [0, 0, 1, 1], [], []>} : vector<8x8xf32>, vector<8x32xf32>, vector<8x32xf32> -> vector<8x32xf32>
    %62 = arith.addf %46, %61 : vector<8x32xf32>
    %63 = vector.extract_strided_slice %38 {offsets = [0, 16], sizes = [8, 16], strides = [1, 1]} : vector<8x32xf32> to vector<8x16xf32>
    %64 = vector.extract_strided_slice %45 {offsets = [0, 16], sizes = [8, 16], strides = [1, 1]} : vector<8x32xf32> to vector<8x16xf32>
    %cst_36 = arith.constant dense<0.000000e+00> : vector<8x8xf32>
    %65 = tpu.matmul %63, %64, %cst_36 {dimension_numbers = #tpu.dot_dimension_numbers<[1], [1], [0], [0], [0, 0, 1, 0], [], []>} : vector<8x16xf32>, vector<8x16xf32>, vector<8x8xf32> -> vector<8x8xf32>
    %cst_37 = arith.constant 2.500000e-01 : f32
    %66 = vector.broadcast %cst_37 : f32 to vector<8x8xf32>
    %67 = arith.mulf %65, %66 : vector<8x8xf32>
    %cst_38 = arith.constant dense<0xFF800000> : vector<8xf32>
    %68 = vector.multi_reduction <maximumf>, %67, %cst_38 [1] : vector<8x8xf32> to vector<8xf32>
    %69 = vector.shape_cast %68 : vector<8xf32> to vector<8x1xf32>
    %70 = vector.broadcast %69 : vector<8x1xf32> to vector<8x8xf32>
    %71 = arith.subf %67, %70 : vector<8x8xf32>
    %72 = math.exp %71 : vector<8x8xf32>
    %cst_39 = arith.constant dense<0.000000e+00> : vector<8xf32>
    %73 = vector.multi_reduction <add>, %72, %cst_39 [1] : vector<8x8xf32> to vector<8xf32>
    %74 = vector.shape_cast %73 : vector<8xf32> to vector<8x1xf32>
    %75 = vector.broadcast %74 : vector<8x1xf32> to vector<8x8xf32>
    %76 = arith.divf %72, %75 : vector<8x8xf32>
    %cst_40 = arith.constant dense<0.000000e+00> : vector<8x32xf32>
    %77 = tpu.matmul %76, %31, %cst_40 {dimension_numbers = #tpu.dot_dimension_numbers<[1], [0], [0], [1], [0, 0, 1, 1], [], []>} : vector<8x8xf32>, vector<8x32xf32>, vector<8x32xf32> -> vector<8x32xf32>
    %78 = arith.addf %62, %77 : vector<8x32xf32>
    %c1 = arith.constant 1 : index
    %c0_41 = arith.constant 0 : index
    %c0_42 = arith.constant 0 : index
    %79 = vector.load %arg6[%c1, %c0_41, %c0_42] : memref<2x8x32xf32, #tpu.memory_space<vmem>>, vector<1x8x32xf32>
    %80 = vector.shape_cast %79 : vector<1x8x32xf32> to vector<8x32xf32>
    %c1_43 = arith.constant 1 : index
    %c0_44 = arith.constant 0 : index
    %c0_45 = arith.constant 0 : index
    %81 = vector.load %arg7[%c1_43, %c0_44, %c0_45] : memref<2x8x32xf32, #tpu.memory_space<vmem>>, vector<1x8x32xf32>
    %82 = vector.shape_cast %81 : vector<1x8x32xf32> to vector<8x32xf32>
    %cst_46 = arith.constant dense<0.000000e+00> : vector<8xf32>
    %83 = vector.multi_reduction <add>, %78, %cst_46 [1] : vector<8x32xf32> to vector<8xf32>
    %84 = vector.shape_cast %83 : vector<8xf32> to vector<8x1xf32>
    %cst_47 = arith.constant 3.200000e+01 : f32
    %85 = vector.broadcast %cst_47 : f32 to vector<8x1xf32>
    %86 = arith.divf %84, %85 : vector<8x1xf32>
    %cst_48 = arith.constant dense<0.000000e+00> : vector<1xf32>
    %87 = vector.multi_reduction <add>, %86, %cst_48 [0] : vector<8x1xf32> to vector<1xf32>
    %88 = vector.shape_cast %87 : vector<1xf32> to vector<1x1xf32>
    %cst_49 = arith.constant 8.000000e+00 : f32
    %89 = vector.broadcast %cst_49 : f32 to vector<1x1xf32>
    %90 = arith.divf %88, %89 : vector<1x1xf32>
    %91 = vector.broadcast %90 : vector<1x1xf32> to vector<8x32xf32>
    %92 = arith.subf %78, %91 : vector<8x32xf32>
    %93 = arith.mulf %92, %92 : vector<8x32xf32>
    %cst_50 = arith.constant dense<0.000000e+00> : vector<8xf32>
    %94 = vector.multi_reduction <add>, %93, %cst_50 [1] : vector<8x32xf32> to vector<8xf32>
    %95 = vector.shape_cast %94 : vector<8xf32> to vector<8x1xf32>
    %cst_51 = arith.constant 3.200000e+01 : f32
    %96 = vector.broadcast %cst_51 : f32 to vector<8x1xf32>
    %97 = arith.divf %95, %96 : vector<8x1xf32>
    %cst_52 = arith.constant dense<0.000000e+00> : vector<1xf32>
    %98 = vector.multi_reduction <add>, %97, %cst_52 [0] : vector<8x1xf32> to vector<1xf32>
    %99 = vector.shape_cast %98 : vector<1xf32> to vector<1x1xf32>
    %cst_53 = arith.constant 8.000000e+00 : f32
    %100 = vector.broadcast %cst_53 : f32 to vector<1x1xf32>
    %101 = arith.divf %99, %100 : vector<1x1xf32>
    %cst_54 = arith.constant 9.99999974E-6 : f32
    %102 = vector.broadcast %cst_54 : f32 to vector<1x1xf32>
    %103 = arith.addf %101, %102 : vector<1x1xf32>
    %104 = math.rsqrt %103 : vector<1x1xf32>
    %105 = vector.broadcast %104 : vector<1x1xf32> to vector<8x32xf32>
    %106 = arith.mulf %92, %105 : vector<8x32xf32>
    %107 = arith.mulf %106, %80 : vector<8x32xf32>
    %108 = arith.addf %107, %82 : vector<8x32xf32>
    %109 = arith.addf %108, %31 : vector<8x32xf32>
    %c1_55 = arith.constant 1 : index
    %c0_56 = arith.constant 0 : index
    %c0_57 = arith.constant 0 : index
    %110 = vector.load %arg2[%c1_55, %c0_56, %c0_57] : memref<2x32x32xf32, #tpu.memory_space<vmem>>, vector<1x32x32xf32>
    %111 = vector.shape_cast %110 : vector<1x32x32xf32> to vector<32x32xf32>
    %cst_58 = arith.constant dense<0.000000e+00> : vector<8x32xf32>
    %112 = tpu.matmul %109, %111, %cst_58 {dimension_numbers = #tpu.dot_dimension_numbers<[1], [0], [0], [1], [0, 0, 1, 1], [], []>} : vector<8x32xf32>, vector<32x32xf32>, vector<8x32xf32> -> vector<8x32xf32>
    %c1_59 = arith.constant 1 : index
    %c0_60 = arith.constant 0 : index
    %c0_61 = arith.constant 0 : index
    %113 = vector.load %arg3[%c1_59, %c0_60, %c0_61] : memref<2x1x32xf32, #tpu.memory_space<vmem>>, vector<1x1x32xf32>
    %114 = vector.shape_cast %113 : vector<1x1x32xf32> to vector<1x32xf32>
    %115 = vector.broadcast %114 : vector<1x32xf32> to vector<8x32xf32>
    %116 = arith.addf %112, %115 : vector<8x32xf32>
    %c1_62 = arith.constant 1 : index
    %c0_63 = arith.constant 0 : index
    %c0_64 = arith.constant 0 : index
    %117 = vector.load %arg4[%c1_62, %c0_63, %c0_64] : memref<2x32x32xf32, #tpu.memory_space<vmem>>, vector<1x32x32xf32>
    %118 = vector.shape_cast %117 : vector<1x32x32xf32> to vector<32x32xf32>
    %cst_65 = arith.constant dense<0.000000e+00> : vector<8x32xf32>
    %119 = tpu.matmul %109, %118, %cst_65 {dimension_numbers = #tpu.dot_dimension_numbers<[1], [0], [0], [1], [0, 0, 1, 1], [], []>} : vector<8x32xf32>, vector<32x32xf32>, vector<8x32xf32> -> vector<8x32xf32>
    %c1_66 = arith.constant 1 : index
    %c0_67 = arith.constant 0 : index
    %c0_68 = arith.constant 0 : index
    %120 = vector.load %arg5[%c1_66, %c0_67, %c0_68] : memref<2x1x32xf32, #tpu.memory_space<vmem>>, vector<1x1x32xf32>
    %121 = vector.shape_cast %120 : vector<1x1x32xf32> to vector<1x32xf32>
    %122 = vector.broadcast %121 : vector<1x32xf32> to vector<8x32xf32>
    %123 = arith.addf %119, %122 : vector<8x32xf32>
    %cst_69 = arith.constant 0.000000e+00 : f32
    %124 = vector.broadcast %cst_69 : f32 to vector<32x1xf32>
    %125 = vector.extract_strided_slice %116 {offsets = [0, 0], sizes = [8, 16], strides = [1, 1]} : vector<8x32xf32> to vector<8x16xf32>
    %126 = vector.extract_strided_slice %123 {offsets = [0, 0], sizes = [8, 16], strides = [1, 1]} : vector<8x32xf32> to vector<8x16xf32>
    %cst_70 = arith.constant dense<0.000000e+00> : vector<8x8xf32>
    %127 = tpu.matmul %125, %126, %cst_70 {dimension_numbers = #tpu.dot_dimension_numbers<[1], [1], [0], [0], [0, 0, 1, 0], [], []>} : vector<8x16xf32>, vector<8x16xf32>, vector<8x8xf32> -> vector<8x8xf32>
    %cst_71 = arith.constant 2.500000e-01 : f32
    %128 = vector.broadcast %cst_71 : f32 to vector<8x8xf32>
    %129 = arith.mulf %127, %128 : vector<8x8xf32>
    %cst_72 = arith.constant dense<0xFF800000> : vector<8xf32>
    %130 = vector.multi_reduction <maximumf>, %129, %cst_72 [1] : vector<8x8xf32> to vector<8xf32>
    %131 = vector.shape_cast %130 : vector<8xf32> to vector<8x1xf32>
    %132 = vector.broadcast %131 : vector<8x1xf32> to vector<8x8xf32>
    %133 = arith.subf %129, %132 : vector<8x8xf32>
    %134 = math.exp %133 : vector<8x8xf32>
    %cst_73 = arith.constant dense<0.000000e+00> : vector<8xf32>
    %135 = vector.multi_reduction <add>, %134, %cst_73 [1] : vector<8x8xf32> to vector<8xf32>
    %136 = vector.shape_cast %135 : vector<8xf32> to vector<8x1xf32>
    %137 = vector.broadcast %136 : vector<8x1xf32> to vector<8x8xf32>
    %138 = arith.divf %134, %137 : vector<8x8xf32>
    %cst_74 = arith.constant dense<0.000000e+00> : vector<8x32xf32>
    %139 = tpu.matmul %138, %1, %cst_74 {dimension_numbers = #tpu.dot_dimension_numbers<[1], [0], [0], [1], [0, 0, 1, 1], [], []>} : vector<8x8xf32>, vector<8x32xf32>, vector<8x32xf32> -> vector<8x32xf32>
    %c0_75 = arith.constant 0 : index
    %c0_76 = arith.constant 0 : index
    %c0_77 = arith.constant 0 : index
    %140 = vector.load %arg8[%c0_75, %c0_76, %c0_77] : memref<2x8x1xf32, #tpu.memory_space<vmem>>, vector<1x8x1xf32>
    %141 = vector.shape_cast %140 : vector<1x8x1xf32> to vector<8x1xf32>
    %cst_78 = arith.constant dense<0.000000e+00> : vector<32x1xf32>
    %142 = tpu.matmul %139, %141, %cst_78 {dimension_numbers = #tpu.dot_dimension_numbers<[0], [0], [1], [1], [0, 1, 1, 1], [], []>} : vector<8x32xf32>, vector<8x1xf32>, vector<32x1xf32> -> vector<32x1xf32>
    %143 = arith.addf %124, %142 : vector<32x1xf32>
    %c0_79 = arith.constant 0 : index
    %c0_80 = arith.constant 0 : index
    %c0_81 = arith.constant 0 : index
    %144 = vector.load %arg9[%c0_79, %c0_80, %c0_81] : memref<2x1x1xf32, #tpu.memory_space<vmem>>, vector<1x1x1xf32>
    %145 = vector.shape_cast %144 : vector<1x1x1xf32> to vector<1x1xf32>
    %146 = vector.broadcast %145 : vector<1x1xf32> to vector<32x1xf32>
    %147 = arith.addf %143, %146 : vector<32x1xf32>
    %148 = vector.extract_strided_slice %116 {offsets = [0, 16], sizes = [8, 16], strides = [1, 1]} : vector<8x32xf32> to vector<8x16xf32>
    %149 = vector.extract_strided_slice %123 {offsets = [0, 16], sizes = [8, 16], strides = [1, 1]} : vector<8x32xf32> to vector<8x16xf32>
    %cst_82 = arith.constant dense<0.000000e+00> : vector<8x8xf32>
    %150 = tpu.matmul %148, %149, %cst_82 {dimension_numbers = #tpu.dot_dimension_numbers<[1], [1], [0], [0], [0, 0, 1, 0], [], []>} : vector<8x16xf32>, vector<8x16xf32>, vector<8x8xf32> -> vector<8x8xf32>
    %cst_83 = arith.constant 2.500000e-01 : f32
    %151 = vector.broadcast %cst_83 : f32 to vector<8x8xf32>
    %152 = arith.mulf %150, %151 : vector<8x8xf32>
    %cst_84 = arith.constant dense<0xFF800000> : vector<8xf32>
    %153 = vector.multi_reduction <maximumf>, %152, %cst_84 [1] : vector<8x8xf32> to vector<8xf32>
    %154 = vector.shape_cast %153 : vector<8xf32> to vector<8x1xf32>
    %155 = vector.broadcast %154 : vector<8x1xf32> to vector<8x8xf32>
    %156 = arith.subf %152, %155 : vector<8x8xf32>
    %157 = math.exp %156 : vector<8x8xf32>
    %cst_85 = arith.constant dense<0.000000e+00> : vector<8xf32>
    %158 = vector.multi_reduction <add>, %157, %cst_85 [1] : vector<8x8xf32> to vector<8xf32>
    %159 = vector.shape_cast %158 : vector<8xf32> to vector<8x1xf32>
    %160 = vector.broadcast %159 : vector<8x1xf32> to vector<8x8xf32>
    %161 = arith.divf %157, %160 : vector<8x8xf32>
    %cst_86 = arith.constant dense<0.000000e+00> : vector<8x32xf32>
    %162 = tpu.matmul %161, %1, %cst_86 {dimension_numbers = #tpu.dot_dimension_numbers<[1], [0], [0], [1], [0, 0, 1, 1], [], []>} : vector<8x8xf32>, vector<8x32xf32>, vector<8x32xf32> -> vector<8x32xf32>
    %c1_87 = arith.constant 1 : index
    %c0_88 = arith.constant 0 : index
    %c0_89 = arith.constant 0 : index
    %163 = vector.load %arg8[%c1_87, %c0_88, %c0_89] : memref<2x8x1xf32, #tpu.memory_space<vmem>>, vector<1x8x1xf32>
    %164 = vector.shape_cast %163 : vector<1x8x1xf32> to vector<8x1xf32>
    %cst_90 = arith.constant dense<0.000000e+00> : vector<32x1xf32>
    %165 = tpu.matmul %162, %164, %cst_90 {dimension_numbers = #tpu.dot_dimension_numbers<[0], [0], [1], [1], [0, 1, 1, 1], [], []>} : vector<8x32xf32>, vector<8x1xf32>, vector<32x1xf32> -> vector<32x1xf32>
    %166 = arith.addf %147, %165 : vector<32x1xf32>
    %c1_91 = arith.constant 1 : index
    %c0_92 = arith.constant 0 : index
    %c0_93 = arith.constant 0 : index
    %167 = vector.load %arg9[%c1_91, %c0_92, %c0_93] : memref<2x1x1xf32, #tpu.memory_space<vmem>>, vector<1x1x1xf32>
    %168 = vector.shape_cast %167 : vector<1x1x1xf32> to vector<1x1xf32>
    %169 = vector.broadcast %168 : vector<1x1xf32> to vector<32x1xf32>
    %170 = arith.addf %166, %169 : vector<32x1xf32>
    %c0_94 = arith.constant 0 : index
    %c0_95 = arith.constant 0 : index
    %c0_96 = arith.constant 0 : index
    %171 = vector.load %arg10[%c0_94, %c0_95, %c0_96] : memref<1x32x1xf32, #tpu.memory_space<vmem>>, vector<1x32x1xf32>
    %172 = vector.shape_cast %171 : vector<1x32x1xf32> to vector<32x1xf32>
    %173 = vector.shape_cast %170 : vector<32x1xf32> to vector<1x32x1xf32>
    tpu.vector_store %arg10[%c0_94, %c0_95, %c0_96], %173 {strides = array<i32>} : memref<1x32x1xf32, #tpu.memory_space<vmem>>, vector<1x32x1xf32>,
    return
  }
  func.func @transform_0(%arg0: i32) -> (i32, i32, i32) {
    %c0_i32 = arith.constant 0 : i32
    %c0_i32_0 = arith.constant 0 : i32
    %c0_i32_1 = arith.constant 0 : i32
    return %arg0, %c0_i32, %c0_i32_0 : i32, i32, i32
  }
  func.func @transform_1(%arg0: i32) -> (i32, i32, i32) {
    %c0_i32 = arith.constant 0 : i32
    %c0_i32_0 = arith.constant 0 : i32
    %c0_i32_1 = arith.constant 0 : i32
    %c0_i32_2 = arith.constant 0 : i32
    return %c0_i32, %c0_i32_0, %c0_i32_1 : i32, i32, i32
  }
  func.func @transform_2(%arg0: i32) -> (i32, i32, i32) {
    %c0_i32 = arith.constant 0 : i32
    %c0_i32_0 = arith.constant 0 : i32
    %c0_i32_1 = arith.constant 0 : i32
    %c0_i32_2 = arith.constant 0 : i32
    return %c0_i32, %c0_i32_0, %c0_i32_1 : i32, i32, i32
  }
  func.func @transform_3(%arg0: i32) -> (i32, i32, i32) {
    %c0_i32 = arith.constant 0 : i32
    %c0_i32_0 = arith.constant 0 : i32
    %c0_i32_1 = arith.constant 0 : i32
    %c0_i32_2 = arith.constant 0 : i32
    return %c0_i32, %c0_i32_0, %c0_i32_1 : i32, i32, i32
  }
  func.func @transform_4(%arg0: i32) -> (i32, i32, i32) {
    %c0_i32 = arith.constant 0 : i32
    %c0_i32_0 = arith.constant 0 : i32
    %c0_i32_1 = arith.constant 0 : i32
    %c0_i32_2 = arith.constant 0 : i32
    return %c0_i32, %c0_i32_0, %c0_i32_1 : i32, i32, i32
  }
  func.func @transform_5(%arg0: i32) -> (i32, i32, i32) {
    %c0_i32 = arith.constant 0 : i32
    %c0_i32_0 = arith.constant 0 : i32
    %c0_i32_1 = arith.constant 0 : i32
    %c0_i32_2 = arith.constant 0 : i32
    return %c0_i32, %c0_i32_0, %c0_i32_1 : i32, i32, i32
  }
  func.func @transform_6(%arg0: i32) -> (i32, i32, i32) {
    %c0_i32 = arith.constant 0 : i32
    %c0_i32_0 = arith.constant 0 : i32
    %c0_i32_1 = arith.constant 0 : i32
    %c0_i32_2 = arith.constant 0 : i32
    return %c0_i32, %c0_i32_0, %c0_i32_1 : i32, i32, i32
  }
  func.func @transform_7(%arg0: i32) -> (i32, i32, i32) {
    %c0_i32 = arith.constant 0 : i32
    %c0_i32_0 = arith.constant 0 : i32
    %c0_i32_1 = arith.constant 0 : i32
    %c0_i32_2 = arith.constant 0 : i32
    return %c0_i32, %c0_i32_0, %c0_i32_1 : i32, i32, i32
  }
  func.func @transform_8(%arg0: i32) -> (i32, i32, i32) {
    %c0_i32 = arith.constant 0 : i32
    %c0_i32_0 = arith.constant 0 : i32
    %c0_i32_1 = arith.constant 0 : i32
    %c0_i32_2 = arith.constant 0 : i32
    return %c0_i32, %c0_i32_0, %c0_i32_1 : i32, i32, i32
  }
  func.func @transform_9(%arg0: i32) -> (i32, i32, i32) {
    %c0_i32 = arith.constant 0 : i32
    %c0_i32_0 = arith.constant 0 : i32
    %c0_i32_1 = arith.constant 0 : i32
    return %arg0, %c0_i32, %c0_i32_0 : i32, i32, i32
  }
}

</mosaic_0001>

<bundles_post_ra>
// kernel: ms_loss_pallas.1
= control target key start
LH: loop header
LB: loop body
LE: loop exit
PB: predicated region body
PF: predicated region fallthrough
CT: control target
= control target key end

     0   :  { %14 = vsyncpa [#allocation3], 0  ;;  %s2690_s0 = inlined_call_operand.vmem [shape: f32[2,8,32], index: 0, kind: input, shape index: {}]   ;;  %s2691_s1 = inlined_call_operand.hbm [shape: f32[2,32,32], index: 1, kind: input, shape index: {}]   ;;  %s2692_s2 = inlined_call_operand.hbm [shape: f32[2,1,32], index: 2, kind: input, shape index: {}]   ;;  %s2693_s3 = inlined_call_operand.hbm [shape: f32[2,32,32], index: 3, kind: input, shape index: {}]   ;;  %s2694_s4 = inlined_call_operand.hbm [shape: f32[2,1,32], index: 4, kind: input, shape index: {}]   ;;  %s2695_s5 = inlined_call_operand.vmem [shape: f32[2,8,32], index: 5, kind: input, shape index: {}]   ;;  %s2696_s6 = inlined_call_operand.hbm [shape: f32[2,8,32], index: 6, kind: input, shape index: {}]   ;;  %s2697_s7 = inlined_call_operand.vmem [shape: f32[2,8,1], index: 7, kind: input, shape index: {}]   ;;  %s2698_s8 = inlined_call_operand.vmem [shape: f32[2,1,1], index: 8, kind: input, shape index: {}]   ;;  %s2699_s9 = inlined_call_operand.vmem [shape: f32[2,32,1], index: 9, kind: output, shape index: {}]  }
   0x1   :  { %15 = vsyncpa [#allocation5], 0 }
   0x2   :  { %16 = vsyncpa [#allocation8], 0  ;;  %s2394_s30 = smov 0  }
   0x3 LB: > { %s2331_s10 = smov [#allocation4]   ;;  %s2400_s12 = sadd.s32 4294967295, %s2329_s30   ;;  %s2329_s30 = sphi %s2394_s30, %s22_s30  }
   0x4   : > { %s272_s11 = sshll.u32 %s2331_s10, 4  ;;  %p1852_p0 = scmp.ge.s32.totalorder %s2329_s30, 1  ;;  %s2405_s11 = int_to_ptr.vmem [resolvable:$true] %s272_s11 }
   0x5   : > { %p247_p1 = scmp.lt.s32.totalorder %s2329_s30, 3  ;;  %p2700_p2 = scmp.eq.s32.totalorder %s2400_s12, 0 }
   0x6   : > { %s2332_s14 = smov [#allocation7]   ;;  %s2333_s17 = smov [#allocation2]  }
   0x7   : > { %p2407_p3 = pnand %p1852_p0, %p247_p1  ;;  %s298_s15 = sshll.u32 %s2332_s14, 4  ;;  %s2413_s15 = int_to_ptr.vmem [resolvable:$true] %s298_s15 }
   0x8   : > { %s259_s18 = sshll.u32 %s2333_s17, 4  ;;  %s2171_s21 = scalar_lea.hbm %s2692_s2, 32  ;;  %s2421_s18 = int_to_ptr.vmem [resolvable:$true] %s259_s18 }
   0x9   : > { %s2702_s13 = scalar_select %p2407_p3, 1, 0 }
   0xa   : > { %p2104_p4 = pneg %p2407_p3  ;;  %p2172_p6 = scmp.ne.s32.totalorder %s2692_s2, %s2171_s21 }
   0xb   : > { %p2178_p10 = scmp.lt.u32.totalorder %s2171_s21, %s2692_s2 }
   0xc   : > { %p2417_p5 = pnand %p2700_p2, %p2104_p4 }
   0xe   : > { %p2431_p7 = pneg %p2417_p5 }
  0x10   : > { %p2174_p8 = pnand %p2431_p7, %p2172_p6 }
  0x12   : > { %p2175_p9 = pneg %p2174_p8 }
  0x14   : > { %p2180_p11 = pnand %p2178_p10, %p2175_p9 }
  0x16   : > { %2183 = shalt.err (!%p2180_p11)
}
  0x17   : > { %s2184_s27 = scalar_lea.vmem %s2405_s11, 32  ;;  %p2192_p1 = scmp.lt.s32.totalorder %s2405_s11, %s2405_s11 }
  0x18   : > { %p2185_p12 = scmp.ne.s32.totalorder %s2405_s11, %s2184_s27  ;;  %p2193_p4 = scmp.lt.s32.totalorder %s2184_s27, %s2184_s27 }
  0x1a   : > { %p2187_p13 = pnand %p2185_p12, %p2431_p7  ;;  %p2194_p6 = por %p2193_p4, %p2192_p1 }
  0x1c   : > { %p2188_p0 = pneg %p2187_p13 }
  0x1e   : > { %p2195_p8 = pnand %p2194_p6, %p2188_p0 }
  0x20   : > { %2198 = shalt.err (!%p2195_p8)
}
  0x21   : > { %s2334_s28 = smov 16   ;;  %s2335_s29 = smov 1  }
  0x22   : > { %2110 = dma.hbm_to_vmem [thread:$0]  (!%p2417_p5), %s2692_s2, 32, %s2405_s11, [#allocation5], %s2334_s28, %s2334_s28, %s2335_s29  }
  0x23   : > { %s2199_s20 = scalar_lea.hbm %s2694_s4, 32 }
  0x24   : > { %p2200_p9 = scmp.ne.s32.totalorder %s2694_s4, %s2199_s20  ;;  %p2206_p12 = scmp.lt.u32.totalorder %s2199_s20, %s2694_s4 }
  0x26   : > { %p2202_p10 = pnand %p2200_p9, %p2431_p7 }
  0x28   : > { %p2203_p11 = pneg %p2202_p10 }
  0x2a   : > { %p2208_p13 = pnand %p2206_p12, %p2203_p11 }
  0x2c   : > { %2211 = shalt.err (!%p2208_p13)
}
  0x2d   : > { %s2212_s11 = scalar_lea.vmem %s2413_s15, 32  ;;  %p2220_p6 = scmp.lt.s32.totalorder %s2413_s15, %s2413_s15 }
  0x2e   : > { %p2213_p0 = scmp.ne.s32.totalorder %s2413_s15, %s2212_s11  ;;  %p2221_p8 = scmp.lt.s32.totalorder %s2212_s11, %s2212_s11 }
  0x30   : > { %p2215_p1 = pnand %p2213_p0, %p2431_p7  ;;  %p2222_p9 = por %p2221_p8, %p2220_p6 }
  0x32   : > { %p2216_p4 = pneg %p2215_p1 }
  0x34   : > { %p2223_p10 = pnand %p2222_p9, %p2216_p4 }
  0x36   : > { %2226 = shalt.err (!%p2223_p10)
}
  0x37   : > { %2116 = dma.hbm_to_vmem [thread:$0]  (!%p2417_p5), %s2694_s4, 32, %s2413_s15, [#allocation8], %s2334_s28, %s2334_s28, %s2335_s29  }
  0x38   : > { %s2227_s17 = scalar_lea.hbm %s2691_s1, 1024 }
  0x39   : > { %p2228_p11 = scmp.ne.s32.totalorder %s2691_s1, %s2227_s17  ;;  %p2234_p0 = scmp.lt.u32.totalorder %s2227_s17, %s2691_s1 }
  0x3b   : > { %p2230_p12 = pnand %p2228_p11, %p2431_p7 }
  0x3d   : > { %p2231_p13 = pneg %p2230_p12 }
  0x3f   : > { %p2236_p1 = pnand %p2234_p0, %p2231_p13 }
  0x41   : > { %2239 = shalt.err (!%p2236_p1)
}
  0x42   : > { %s2240_s15 = scalar_lea.vmem %s2421_s18, 1024  ;;  %p2248_p9 = scmp.lt.s32.totalorder %s2421_s18, %s2421_s18 }
  0x43   : > { %p2241_p4 = scmp.ne.s32.totalorder %s2421_s18, %s2240_s15  ;;  %p2249_p10 = scmp.lt.s32.totalorder %s2240_s15, %s2240_s15 }
  0x45   : > { %p2243_p6 = pnand %p2241_p4, %p2431_p7  ;;  %p2250_p11 = por %p2249_p10, %p2248_p9 }
  0x47   : > { %p2244_p8 = pneg %p2243_p6 }
  0x49   : > { %p2251_p12 = pnand %p2250_p11, %p2244_p8 }
  0x4b   : > { %2254 = shalt.err (!%p2251_p12)
}
  0x4c   : > { %s2336_s28 = smov 128   ;;  %s2337_s29 = smov 8  }
  0x4d   : > { %2107 = dma.hbm_to_vmem [thread:$0]  (!%p2417_p5), %s2691_s1, 1024, %s2421_s18, [#allocation3], %s2336_s28, %s2336_s28, %s2337_s29  }
  0x4e   : > { %s2338_s11 = smov [#allocation6]   ;;  %s2339_s27 = smov [#allocation9]  }
  0x4f   : > { %s285_s26 = sshll.u32 %s2338_s11, 4  ;;  %s314_s10 = sshll.u32 %s2339_s27, 4  ;;  %s286_s26 = int_to_ptr.vmem [resolvable:$true] %s285_s26  ;;  %s2501_s10 = int_to_ptr.vmem [resolvable:$true] %s314_s10 }
  0x50   : > { %s2255_s19 = scalar_lea.hbm %s2693_s3, 1024 }
  0x51   : > { %p2256_p13 = scmp.ne.s32.totalorder %s2693_s3, %s2255_s19  ;;  %p2262_p4 = scmp.lt.u32.totalorder %s2255_s19, %s2693_s3 }
  0x53   : > { %p2258_p0 = pnand %p2256_p13, %p2431_p7 }
  0x55   : > { %p2259_p1 = pneg %p2258_p0 }
  0x57   : > { %p2264_p6 = pnand %p2262_p4, %p2259_p1 }
  0x59   : > { %2267 = shalt.err (!%p2264_p6)
}
  0x5a   : > { %s2268_s15 = scalar_lea.vmem %s286_s26, 1024  ;;  %p2276_p11 = scmp.lt.s32.totalorder %s286_s26, %s286_s26 }
  0x5b   : > { %p2269_p8 = scmp.ne.s32.totalorder %s286_s26, %s2268_s15  ;;  %p2277_p12 = scmp.lt.s32.totalorder %s2268_s15, %s2268_s15 }
  0x5d   : > { %p2271_p9 = pnand %p2269_p8, %p2431_p7  ;;  %p2278_p2 = por %p2277_p12, %p2276_p11 }
  0x5f   : > { %p2272_p10 = pneg %p2271_p9 }
  0x61   : > { %p2279_p3 = pnand %p2278_p2, %p2272_p10 }
  0x63   : > { %2282 = shalt.err (!%p2279_p3)
}
  0x64   : > { %2113 = dma.hbm_to_vmem [thread:$0]  (!%p2417_p5), %s2693_s3, 1024, %s286_s26, [#allocation5], %s2336_s28, %s2336_s28, %s2337_s29  }
  0x65   : > { %s2283_s14 = scalar_lea.hbm %s2696_s6, 256 }
  0x66   : > { %p2284_p13 = scmp.ne.s32.totalorder %s2696_s6, %s2283_s14  ;;  %p2290_p0 = scmp.lt.u32.totalorder %s2283_s14, %s2696_s6 }
  0x68   : > { %p2286_p2 = pnand %p2284_p13, %p2431_p7 }
  0x6a   : > { %p2287_p3 = pneg %p2286_p2 }
  0x6c   : > { %p2292_p1 = pnand %p2290_p0, %p2287_p3 }
  0x6e   : > { %2295 = shalt.err (!%p2292_p1)
}
  0x6f   : > { %s2296_s26 = scalar_lea.vmem %s2501_s10, 256  ;;  %p2304_p9 = scmp.lt.s32.totalorder %s2501_s10, %s2501_s10 }
  0x70   : > { %p2297_p4 = scmp.ne.s32.totalorder %s2501_s10, %s2296_s26  ;;  %p2305_p10 = scmp.lt.s32.totalorder %s2296_s26, %s2296_s26 }
  0x72   : > { %p2299_p6 = pnand %p2297_p4, %p2431_p7  ;;  %p2306_p11 = por %p2305_p10, %p2304_p9 }
  0x74   : > { %p2300_p8 = pneg %p2299_p6 }
  0x76   : > { %p2307_p12 = pnand %p2306_p11, %p2300_p8 }
  0x78   : > { %2310 = shalt.err (!%p2307_p12)
}
  0x79   : > { %2119 = dma.hbm_to_vmem [thread:$0]  (!%p2417_p5), %s2696_s6, 256, %s2501_s10, [#allocation8], %s2336_s28, %s2336_s28, %s2337_s29  }
  0x7a   : > { %p2705_p13 = scmp.ne.s32.totalorder %s2702_s13, 0 }
  0x7b   : > { %p2706_p7 = scmp.eq.s32.totalorder (!%p2705_p13), %s2400_s12, 0 }
  0x7c   : > { %343 = sbr.rel (%p2705_p13) target bundleno = 3758 (0xeae), region = 56 }
  0x83   : > { %2316 = dma.done.wait (%p2706_p7), [#allocation3], 1024   ;;  %p2707_p2 = pmov %p2706_p7 }
  0x85   : > { %2318 = vsyncadd (%p2707_p2), [#allocation3], 4294966272  ;;  %p2708_p3 = pmov %p2707_p2 }
  0x86   : > { %p2709_p0 = pmov %p2707_p2 }
  0x87   : > { %2320 = dma.done.wait (%p2708_p3), [#allocation5], 1056  }
  0x88   : > { %2322 = vsyncadd (%p2709_p0), [#allocation5], 4294966240  ;;  %p2710_p1 = pmov %p2709_p0 }
  0x89   : > { %p2711_p5 = pmov %p2709_p0 }
  0x8a   : > { %2324 = dma.done.wait (%p2710_p1), [#allocation8], 288  }
  0x8b   : > { %2326 = vsyncadd (%p2711_p5), [#allocation8], 4294967008  ;;  %p394_p4 = scmp.lt.s32.totalorder %s2400_s12, 1  ;;  %vm406_vm0 = vcmask 261120   ;;  %v438_v14 = vld [vmem:[#allocation2] sm:$0xff]  ;;  %v439_v15 = vld [vmem:[#allocation2 + $0x8] sm:$0xff] }
  0x8c   : > { %v522_v16 = vld [vmem:[#allocation6] sm:$0xff]  ;;  %v2340_v17 = vmov 0.0|0.0   ;;  %v2051_v18 = vpack.c.bf16 %v439_v15, %v438_v14  ;;  %v523_v19 = vld [vmem:[#allocation6 + $0x8] sm:$0xff]  ;;  %v441_v21 = vld [vmem:[#allocation2 + $0x18] sm:$0xff]  ;;  %vm2341_vm1 = vmmov 0   ;;  %v2342_v25 = vmov 0.0  }
  0x8d   : > { %s2713_s12 = smov (!%p394_p4, %s2400_s12), 1  ;;  %2050 = vmatprep.subr.bf16.mxu0 %v2340_v17  ;;  %2056 = vmatprep.subr.bf16.mxu1 %v2340_v17  ;;  %v440_v20 = vld [vmem:[#allocation2 + $0x10] sm:$0xff]  ;;  %v2057_v22 = vpack.c.bf16 %v523_v19, %v522_v16  ;;  %v525_v24 = vld [vmem:[#allocation6 + $0x18] sm:$0xff]  ;;  %v405_v41 = vld [vmem:[#allocation9] sm:$0xff]  ;;  %vm603_vm2 = vcmask 130048   ;;  %s2343_s15 = smov 112  }
  0x8e   : > { %s1865_s13 = sshll.u32 %s2713_s12, 3  ;;  %v524_v23 = vld [vmem:[#allocation6 + $0x10] sm:$0xff]  ;;  %1958 = vmatprep.mubr.msk.f32.mxu0 %vm2341_vm1, %v2342_v25  ;;  %1969 = vmatprep.mubr.msk.f32.mxu1 %vm2341_vm1, %v2342_v25  ;;  %v2054_v26 = vpack.c.bf16 %v441_v21, %v440_v20  ;;  %v404_v39 = vld [vmem:[%s2695_s5] sm:$0xff]  ;;  %vm681_vm3 = vcmask 64512   ;;  %s1903_s21 = sshll.u32 %s2713_s12, 5  ;;  %vm1740_vm4 = vcmask 7168  }
  0x8f   : > { %s397_s28 = scalar_lea.vmem %s2690_s0, %s1865_s13  ;;  %2052 = vmatpush3.bf16.msra.mxu0 %v2051_v18  ;;  %2058 = vmatpush3.bf16.msra.mxu1 %v2057_v22  ;;  %v2060_v27 = vpack.c.bf16 %v525_v24, %v524_v23  ;;  %v1870_v44 = vld [vmem:[#allocation7] ss:$0 sm:$0xff]  ;;  %v1868_v47 = vld [vmem:[#allocation4] ss:$0 sm:$0xff]  ;;  %s402_s16 = scalar_lea.vmem %s2699_s9, %s1903_s21 }
  0x90   : > { %v2572_v0 = vld [vmem:[%s397_s28] sm:$0xff]  ;;  %2053 = vmatprep.subr.bf16.mxu0 %v2340_v17  ;;  %2059 = vmatprep.subr.bf16.mxu1 %v2340_v17 }
  0x91   : > { %v407_v1 = vsel %vm406_vm0, %v2572_v0, 0.0 }
  0x92   : > { %408 = vadd.xlane.f32.xlu0 %v407_v1 }
  0x93   : > { %2055 = vmatpush3.bf16.msra.mxu0 %v2054_v26  ;;  %2061 = vmatpush3.bf16.msra.mxu1 %v2060_v27 }
  0x94   : > { %1982 = vmatprep.subr.mxu0 %v2342_v25  ;;  %1972 = vmatprep.subr.mxu1 %v2342_v25 }
 0x11f   : > { %v409_v2 = vpop.xlane.xlu0 %408 }
 0x120   : > { %v411_v3 = vmul.f32 0.03125, %v409_v2 }
 0x122   : > { %v412_v4 = vrot.slane %v411_v3, 4 }
 0x124   : > { %v413_v5 = vadd.f32 %v412_v4, %v411_v3 }
 0x126   : > { %v414_v6 = vrot.slane %v413_v5, 2 }
 0x128   : > { %v415_v7 = vadd.f32 %v414_v6, %v413_v5 }
 0x12a   : > { %v416_v8 = vrot.slane %v415_v7, 1 }
 0x12c   : > { %v417_v9 = vadd.f32 %v416_v8, %v415_v7 }
 0x12e   : > { %v419_v10 = vmul.f32 0.125, %v417_v9 }
 0x130   : > { %v420_v11 = vsub.f32 %v2572_v0, %v419_v10 }
 0x132   : > { %v421_v12 = vmul.f32 %v420_v11, %v420_v11 }
 0x134   : > { %v422_v13 = vsel %vm406_vm0, %v421_v12, 0.0 }
 0x135   : > { %423 = vadd.xlane.f32.xlu0 %v422_v13 }
 0x1c2   : > { %v424_v28 = vpop.xlane.xlu0 %423 }
 0x1c3   : > { %v425_v29 = vmul.f32 0.03125, %v424_v28 }
 0x1c5   : > { %v426_v30 = vrot.slane %v425_v29, 4 }
 0x1c7   : > { %v427_v31 = vadd.f32 %v426_v30, %v425_v29 }
 0x1c9   : > { %v428_v32 = vrot.slane %v427_v31, 2 }
 0x1cb   : > { %v429_v33 = vadd.f32 %v428_v32, %v427_v31  ;;  %v964_v32 = vld [vmem:[#allocation2 + $0x20] sm:$0xff] }
 0x1cd   : > { %v430_v34 = vrot.slane %v429_v33, 1 }
 0x1cf   : > { %v431_v35 = vadd.f32 %v430_v34, %v429_v33  ;;  %v965_v33 = vld [vmem:[#allocation2 + $0x28] sm:$0xff] }
 0x1d0   : > { %v1050_v34 = vld [vmem:[#allocation6 + $0x20] sm:$0xff] }
 0x1d1   : > { %v432_v36 = vmul.f32 0.125, %v431_v35  ;;  %v2063_v35 = vpack.c.bf16 %v965_v33, %v964_v32 }
 0x1d3   : > { %v433_v37 = vadd.f32 1e-05, %v432_v36  ;;  %v1051_v36 = vld [vmem:[#allocation6 + $0x28] sm:$0xff] }
 0x1d5   : > { %2151 = vrsqrt.f32 %v433_v37  ;;  %v966_v37 = vld [vmem:[#allocation2 + $0x30] sm:$0xff] }
 0x1df   : > { %v2152_v38 = vpop.eup %2151 }
 0x1e0   : > { %v435_v40 = vmul.f32 %v2152_v38, %v420_v11  ;;  %v967_v38 = vld [vmem:[#allocation2 + $0x38] sm:$0xff] }
 0x1e2   : > { %v436_v42 = vmul.f32 %v435_v40, %v404_v39  ;;  %v2069_v39 = vpack.c.bf16 %v1051_v36, %v1050_v34  ;;  %v1052_v40 = vld [vmem:[#allocation6 + $0x30] sm:$0xff]  ;;  %v1293_v34 = vld [vmem:[%s2697_s7] sm:$0xff] }
 0x1e4   : > { %v2591_v43 = vadd.f32 %v436_v42, %v405_v41  ;;  %v1053_v41 = vld [vmem:[#allocation6 + $0x38] sm:$0xff]  ;;  %v2066_v42 = vpack.c.bf16 %v967_v38, %v966_v37 }
 0x1e6   : > { %1959 = vmatmul.mubr.msk.f32.vlgmr.msra.gmra.mrb[0].mxu0 %vm406_vm0, %v2591_v43  ;;  %1970 = vmatmul.mubr.msk.f32.vlgmr.msra.gmra.mrb[0].mxu1 %vm406_vm0, %v2591_v43 }
 0x1e7   : > { %1983 = vmatpush3.msra.mxu0 %v2591_v43  ;;  %1974 = vmatprep.mubr.msk.f32.mxu1 %vm2341_vm1, %v2342_v25 }
 0x1e8   : > { %1984 = vmatprep.mubr.msk.f32.mxu0 %vm2341_vm1, %v2342_v25  ;;  %1987 = vmatprep.subr.mxu0 %v2342_v25 }
 0x2b9   : > { %v518_v45 = vpop.f32.mrb[0].mxu0  ;;  %v599_v46 = vpop.f32.mrb[0].mxu1 }
 0x2ba   : > { %v600_v48 = vadd.f32 %v1870_v44, %v599_v46  ;;  %v1960_v49 = vpop.f32.mrb[1].mxu0  ;;  %v1971_v50 = vpop.f32.mrb[1].mxu1  ;;  %v519_v51 = vadd.f32 %v1868_v47, %v518_v45  ;;  %v2072_v44 = vpack.c.bf16 %v1053_v41, %v1052_v40  ;;  %v1894_v40 = vld [vmem:[%s2697_s7 + $0x8] sm:$0xff] }
 0x2bc   : > { %695 = vrot.lane.b32.xlu1 %v600_v48, %s2343_s15  ;;  %1973 = vmatpush3.xpose.msk.msra.mxu1 %vm603_vm2, %v600_v48 }
 0x2bd   : > { %1977 = vmatprep.subr.mxu1 %v2342_v25 }
 0x2bf   : > { %1975 = vmatmul.mubr.msk.f32.vlgmr.msra.gmra.mrb[2].mxu1 %vm603_vm2, %v519_v51 }
 0x2c0   : > { %693 = vrot.lane.b32.xlu1 %v519_v51, %s2343_s15  ;;  %1979 = vmatprep.mubr.msk.f32.mxu1 %vm2341_vm1, %v2342_v25 }
 0x32e   : > { %v696_v52 = vpop.permute.xlu1 %695 }
 0x32f   : > { %1978 = vmatpush3.xpose.msk.msra.mxu1 %vm603_vm2, %v696_v52 }
 0x330   : > { %2062 = vmatprep.subr.bf16.mxu1 %v2340_v17 }
 0x332   : > { %v694_v53 = vpop.permute.xlu1 %693 }
 0x333   : > { %1980 = vmatmul.mubr.msk.f32.vlgmr.msra.gmra.mrb[4].mxu1 %vm603_vm2, %v694_v53 }
 0x334   : > { %2000 = vmatprep.mubr.msk.f32.mxu1 %vm2341_vm1, %v2342_v25  ;;  %2064 = vmatpush3.bf16.msra.mxu1 %v2063_v35 }
 0x335   : > { %2065 = vmatprep.subr.bf16.mxu1 %v2340_v17 }
 0x338   : > { %2067 = vmatpush3.bf16.msra.mxu1 %v2066_v42 }
 0x339   : > { %2014 = vmatprep.subr.mxu1 %v2342_v25 }
 0x392   : > { %v676_v54 = vpop.f32.mrb[2].mxu1 }
 0x393   : > { %v680_v55 = vmul.f32 0.25, %v676_v54  ;;  %v1976_v56 = vpop.f32.mrb[3].mxu1 }
 0x395   : > { %v682_v57 = vsel %vm681_vm3, %v680_v55, -inf }
 0x396   : > { %683 = vmax.xlane.f32.xlu1 %v682_v57  ;;  %v932_v57 = vld [vmem:[#allocation9 + $0x8] sm:$0xff] }
 0x406   : > { %v767_v58 = vpop.f32.mrb[4].mxu1 }
 0x407   : > { %v771_v59 = vmul.f32 0.25, %v767_v58  ;;  %v1981_v60 = vpop.f32.mrb[5].mxu1 }
 0x409   : > { %v772_v61 = vsel %vm681_vm3, %v771_v59, -inf }
 0x40a   : > { %773 = vmax.xlane.f32.xlu0 %v772_v61  ;;  %v1879_v61 = vld [vmem:[#allocation4 + $0x1] ss:$0 sm:$0xff] }
 0x423   : > { %v684_v62 = vpop.xlane.xlu1 %683 }
 0x424   : > { %v685_v63 = vsub.f32 %v680_v55, %v684_v62  ;;  %v1881_v62 = vld [vmem:[#allocation7 + $0x1] ss:$0 sm:$0xff] }
 0x426   : > { %v686_v3 = vmul.f32 1.442695, %v685_v63 }
 0x497   : > { %v774_v1 = vpop.xlane.xlu0 %773 }
 0x498   : > { %v775_v2 = vsub.f32 %v771_v59, %v774_v1 }
 0x49a   : > { %v776_v4 = vmul.f32 1.442695, %v775_v2 }
 0x49c   : > { %2153 = vpow2.f32 %v776_v4 }
 0x49d   : > { %2155 = vpow2.f32 %v686_v3 }
 0x4a6   : > { %v2154_v5 = vpop.eup %2153 }
 0x4a7   : > { %v778_v6 = vsel %vm681_vm3, %v2154_v5, 0.0  ;;  %v2156_v7 = vpop.eup %2155 }
 0x4a8   : > { %779 = vadd.xlane.f32.xlu0 %v778_v6  ;;  %v688_v8 = vsel %vm681_vm3, %v2156_v7, 0.0 }
 0x4ac   : > { %689 = vadd.xlane.f32.xlu0 %v688_v8 }
 0x535   : > { %v780_v9 = vpop.xlane.xlu0 %779 }
 0x536   : > { %2157 = vrcp.f32 %v780_v9 }
 0x539   : > { %v690_v10 = vpop.xlane.xlu0 %689 }
 0x53a   : > { %2159 = vrcp.f32 %v690_v10 }
 0x540   : > { %v2158_v11 = vpop.eup %2157 }
 0x541   : > { %v782_v12 = vmul.f32 %v2158_v11, %v2154_v5 }
 0x543   : > { %1985 = vmatmul.mubr.msk.f32.vlgmr.msra.gmra.mrb[2].mxu0 %vm681_vm3, %v782_v12 }
 0x544   : > { %1988 = vmatpush3.msra.mxu0 %v2591_v43  ;;  %1989 = vmatprep.mubr.msk.f32.mxu0 %vm2341_vm1, %v2342_v25  ;;  %v2160_v13 = vpop.eup %2159 }
 0x545   : > { %2068 = vmatprep.subr.bf16.mxu0 %v2340_v17  ;;  %v692_v14 = vmul.f32 %v2160_v13, %v2156_v7 }
 0x54b   : > { %1990 = vmatmul.mubr.msk.f32.vlgmr.msra.gmra.mrb[2].mxu0 %vm681_vm3, %v692_v14 }
 0x54c   : > { %2011 = vmatprep.mubr.msk.f32.mxu0 %vm2341_vm1, %v2342_v25  ;;  %2070 = vmatpush3.bf16.msra.mxu0 %v2069_v39 }
 0x54d   : > { %2071 = vmatprep.subr.bf16.mxu0 %v2340_v17  ;;  %v1878_v17 = vld [vmem:[%s2695_s5 + $0x8] sm:$0xff] }
 0x550   : > { %2073 = vmatpush3.bf16.msra.mxu0 %v2072_v44 }
 0x551   : > { %2024 = vmatprep.subr.mxu0 %v1293_v34 }
 0x61e   : > { %v925_v15 = vpop.f32.mrb[2].mxu0 }
 0x61f   : > { %v1991_v16 = vpop.f32.mrb[3].mxu0  ;;  %v933_v18 = vsel %vm406_vm0, %v925_v15, 0.0 }
 0x620   : > { %934 = vadd.xlane.f32.xlu0 %v933_v18 }
 0x6ad   : > { %v935_v19 = vpop.xlane.xlu0 %934 }
 0x6ae   : > { %v936_v20 = vmul.f32 0.03125, %v935_v19 }
 0x6b0   : > { %v937_v21 = vrot.slane %v936_v20, 4 }
 0x6b2   : > { %v938_v22 = vadd.f32 %v937_v21, %v936_v20 }
 0x6b4   : > { %v939_v23 = vrot.slane %v938_v22, 2 }
 0x6b6   : > { %v940_v24 = vadd.f32 %v939_v23, %v938_v22 }
 0x6b8   : > { %v941_v26 = vrot.slane %v940_v24, 1 }
 0x6ba   : > { %v942_v27 = vadd.f32 %v941_v26, %v940_v24 }
 0x6bc   : > { %v943_v28 = vmul.f32 0.125, %v942_v27 }
 0x6be   : > { %v944_v29 = vsub.f32 %v925_v15, %v943_v28 }
 0x6c0   : > { %v945_v30 = vmul.f32 %v944_v29, %v944_v29 }
 0x6c2   : > { %v946_v31 = vsel %vm406_vm0, %v945_v30, 0.0 }
 0x6c3   : > { %947 = vadd.xlane.f32.xlu0 %v946_v31 }
 0x750   : > { %v948_v45 = vpop.xlane.xlu0 %947 }
 0x751   : > { %v949_v46 = vmul.f32 0.03125, %v948_v45 }
 0x753   : > { %v950_v47 = vrot.slane %v949_v46, 4 }
 0x755   : > { %v951_v48 = vadd.f32 %v950_v47, %v949_v46  ;;  %v1886_v46 = vld [vmem:[%s2698_s8] ss:$0 sm:$0xff] }
 0x757   : > { %v952_v49 = vrot.slane %v951_v48, 2 }
 0x759   : > { %v953_v50 = vadd.f32 %v952_v49, %v951_v48  ;;  %v1900_v48 = vld [vmem:[%s2698_s8 + $0x1] ss:$0 sm:$0xff] }
 0x75b   : > { %v954_v51 = vrot.slane %v953_v50, 1 }
 0x75d   : > { %v955_v52 = vadd.f32 %v954_v51, %v953_v50 }
 0x75f   : > { %v956_v53 = vmul.f32 0.125, %v955_v52 }
 0x761   : > { %v957_v54 = vadd.f32 1e-05, %v956_v53 }
 0x763   : > { %2161 = vrsqrt.f32 %v957_v54 }
 0x76d   : > { %v2162_v55 = vpop.eup %2161 }
 0x76e   : > { %v959_v56 = vmul.f32 %v2162_v55, %v944_v29 }
 0x770   : > { %v960_v58 = vmul.f32 %v1878_v17, %v959_v56 }
 0x772   : > { %v961_v59 = vadd.f32 %v960_v58, %v932_v57 }
 0x774   : > { %v962_v60 = vadd.f32 %v961_v59, %v2591_v43 }
 0x776   : > { %2001 = vmatmul.mubr.msk.f32.vlgmr.msra.gmra.mrb[6].mxu1 %vm406_vm0, %v962_v60  ;;  %2012 = vmatmul.mubr.msk.f32.vlgmr.msra.gmra.mrb[4].mxu0 %vm406_vm0, %v962_v60 }
 0x777   : > { %2016 = vmatprep.mubr.msk.f32.mxu1 %vm2341_vm1, %v2342_v25  ;;  %2025 = vmatpush3.msra.mxu0 %v1293_v34 }
 0x778   : > { %2042 = vmatprep.subr.mxu0 %v1894_v40 }
 0x849   : > { %v1045_v63 = vpop.f32.mrb[6].mxu1  ;;  %v1128_v1 = vpop.f32.mrb[4].mxu0 }
 0x84a   : > { %v1046_v2 = vadd.f32 %v1879_v61, %v1045_v63  ;;  %v1129_v3 = vadd.f32 %v1881_v62, %v1128_v1  ;;  %v2002_v4 = vpop.f32.mrb[7].mxu1  ;;  %v2013_v5 = vpop.f32.mrb[5].mxu0 }
 0x84c   : > { %1430 = vrot.lane.b32.xlu1 %v1046_v2, %s2343_s15  ;;  %2015 = vmatpush3.xpose.msk.msra.mxu1 %vm603_vm2, %v1129_v3 }
 0x84d   : > { %2019 = vmatprep.subr.mxu1 %v2342_v25 }
 0x84f   : > { %2017 = vmatmul.mubr.msk.f32.vlgmr.msra.gmra.mrb[8].mxu1 %vm603_vm2, %v1046_v2 }
 0x850   : > { %2020 = vmatpush3.msra.mxu1 %v2572_v0  ;;  %2021 = vmatprep.mubr.msk.f32.mxu1 %vm2341_vm1, %v2342_v25 }
 0x851   : > { %2032 = vmatprep.subr.mxu1 %v2342_v25 }
 0x8be   : > { %v1431_v19 = vpop.permute.xlu1 %1430 }
 0x922   : > { %v1204_v43 = vpop.f32.mrb[8].mxu1 }
 0x923   : > { %v1208_v6 = vmul.f32 0.25, %v1204_v43  ;;  %v2018_v7 = vpop.f32.mrb[9].mxu1 }
 0x925   : > { %v1209_v8 = vsel %vm681_vm3, %v1208_v6, -inf }
 0x926   : > { %1210 = vmax.xlane.f32.xlu0 %v1209_v8 }
 0x9b3   : > { %v1211_v9 = vpop.xlane.xlu0 %1210 }
 0x9b4   : > { %v1212_v10 = vsub.f32 %v1208_v6, %v1211_v9 }
 0x9b6   : > { %v1213_v11 = vmul.f32 1.442695, %v1212_v10 }
 0x9b8   : > { %2163 = vpow2.f32 %v1213_v11 }
 0x9c2   : > { %v2164_v12 = vpop.eup %2163 }
 0x9c3   : > { %v1215_v13 = vsel %vm681_vm3, %v2164_v12, 0.0 }
 0x9c4   : > { %1216 = vadd.xlane.f32.xlu0 %v1215_v13 }
 0x9da   : > { %1432 = vrot.lane.b32.xlu0 %v1129_v3, %s2343_s15 }
 0xa51   : > { %v1217_v14 = vpop.xlane.xlu0 %1216 }
 0xa52   : > { %2165 = vrcp.f32 %v1217_v14 }
 0xa55   : > { %v1433_v18 = vpop.permute.xlu0 %1432 }
 0xa5c   : > { %v2166_v15 = vpop.eup %2165 }
 0xa5d   : > { %v1219_v16 = vmul.f32 %v2166_v15, %v2164_v12 }
 0xa5f   : > { %2022 = vmatmul.mubr.msk.f32.vlgmr.msra.gmra.mrb[10].mxu1 %vm681_vm3, %v1219_v16 }
 0xa60   : > { %2033 = vmatpush3.xpose.msk.msra.mxu1 %vm603_vm2, %v1433_v18  ;;  %2034 = vmatprep.mubr.msk.f32.mxu1 %vm2341_vm1, %v2342_v25 }
 0xa61   : > { %2037 = vmatprep.subr.mxu1 %v2342_v25 }
 0xa63   : > { %2035 = vmatmul.mubr.msk.f32.vlgmr.msra.gmra.mrb[12].mxu1 %vm603_vm2, %v1431_v19 }
 0xa64   : > { %2038 = vmatpush3.msra.mxu1 %v2572_v0  ;;  %2039 = vmatprep.mubr.msk.f32.mxu1 %vm2341_vm1, %v2342_v25 }
 0xb32   : > { %v1289_v20 = vpop.f32.mrb[10].mxu1 }
 0xb33   : > { %v2023_v21 = vpop.f32.mrb[11].mxu1 }
 0xb36   : > { %v1504_v22 = vpop.f32.mrb[12].mxu1 }
 0xb37   : > { %v1508_v23 = vmul.f32 0.25, %v1504_v22  ;;  %v2036_v24 = vpop.f32.mrb[13].mxu1 }
 0xb39   : > { %v1509_v26 = vsel %vm681_vm3, %v1508_v23, -inf }
 0xb3a   : > { %1510 = vmax.xlane.f32.xlu0 %v1509_v26 }
 0xb67   : > { %1301 = vxpose.xlu0.b32.start.end [1/1] (short) (narrow) %v1289_v20, 32 }
 0xbc7   : > { %v1511_v27 = vpop.xlane.xlu0 %1510 }
 0xbc8   : > { %v1512_v28 = vsub.f32 %v1508_v23, %v1511_v27 }
 0xbca   : > { %v1513_v29 = vmul.f32 1.442695, %v1512_v28 }
 0xbcc   : > { %2167 = vpow2.f32 %v1513_v29 }
 0xbd6   : > { %v2168_v30 = vpop.eup %2167 }
 0xbd7   : > { %v1515_v31 = vsel %vm681_vm3, %v2168_v30, 0.0 }
 0xbd8   : > { %1516 = vadd.xlane.f32.xlu1 %v1515_v31 }
 0xbe7   : > { %v1317_v33 = vpop.trf.xlu0 }
 0xbe8   : > { %2026 = vmatprep.mubr.msk.f32.mxu0 %vm681_vm3, %v1317_v33 }
 0xbeb   : > { %v1318_v35 = vpop.trf.xlu0 }
 0xbec   : > { %2027 = vmatmul.mubr.msk.f32.vlgmr.msra.gmra.mrb[6].mxu0 %vm681_vm3, %v1318_v35 }
 0xbed   : > { %2043 = vmatpush3.msra.mxu0 %v1894_v40 }
 0xbef   : > { %v1319_v36 = vpop.trf.xlu0 }
 0xbf0   : > { %2029 = vmatprep.mubr.msk.f32.mxu0 %vm681_vm3, %v1319_v36 }
 0xbf3   : > { %v1320_v37 = vpop.trf.xlu0 }
 0xbf4   : > { %2030 = vmatmul.mubr.msk.f32.gmra.mrb[8].mxu0 %vm681_vm3, %v1320_v37 }
 0xc65   : > { %v1517_v0 = vpop.xlane.xlu1 %1516 }
 0xc66   : > { %2169 = vrcp.f32 %v1517_v0 }
 0xc70   : > { %v2170_v25 = vpop.eup %2169 }
 0xc71   : > { %v1519_v32 = vmul.f32 %v2170_v25, %v2168_v30 }
 0xc73   : > { %2040 = vmatmul.mubr.msk.f32.vlgmr.msra.gmra.mrb[14].mxu1 %vm681_vm3, %v1519_v32 }
 0xd46   : > { %v1589_v38 = vpop.f32.mrb[14].mxu1 }
 0xd47   : > { %1595 = vxpose.xlu1.b32.start.end [1/1] (short) (narrow) %v1589_v38, 32  ;;  %v2041_v39 = vpop.f32.mrb[15].mxu1 }
 0xdc7   : > { %v1611_v41 = vpop.trf.xlu1 }
 0xdc8   : > { %2044 = vmatprep.mubr.msk.f32.mxu0 %vm681_vm3, %v1611_v41 }
 0xdcb   : > { %v1612_v42 = vpop.trf.xlu1 }
 0xdcc   : > { %2045 = vmatmul.mubr.msk.f32.vlgmr.msra.gmra.mrb[6].mxu0 %vm681_vm3, %v1612_v42 }
 0xdcf   : > { %v1613_v44 = vpop.trf.xlu1 }
 0xdd0   : > { %2047 = vmatprep.mubr.msk.f32.mxu0 %vm681_vm3, %v1613_v44 }
 0xdd3   : > { %v1614_v45 = vpop.trf.xlu1 }
 0xdd4   : > { %2048 = vmatmul.mubr.msk.f32.gmra.mrb[8].mxu0 %vm681_vm3, %v1614_v45 }
 0xe9f   : > { %v2046_v47 = vpop.f32.mrb[6].mxu0 }
 0xea0   : > { %v2074_v49 = vadd.f32 %v2046_v47, %v1886_v46  ;;  %v1705_v50 = vpop.f32.mrb[7].mxu0 }
 0xea1   : > { %v2075_v51 = vadd.f32 %v1886_v46, %v1705_v50 }
 0xea2   : > { %v1737_v52 = vadd.f32 %v2074_v49, %v1900_v48 }
 0xea3   : > { %v1736_v53 = vadd.f32 %v2075_v51, %v1900_v48 }
 0xea4   : > { %1742 = vst.msk [vmem:[%s402_s16 + $0x8] sm:$0xff] %vm1740_vm4, %v1737_v52 }
 0xea5   : > { %1741 = vst.msk [vmem:[%s402_s16] sm:$0xff] %vm1740_vm4, %v1736_v53 }
 0xea7   : > { %v2049_v54 = vpop.f32.mrb[8].mxu0 }
 0xea8   : > { %v2076_v55 = vadd.f32 %v2049_v54, %v1886_v46  ;;  %v1715_v17 = vpop.f32.mrb[9].mxu0 }
 0xea9   : > { %v2077_v56 = vadd.f32 %v1886_v46, %v1715_v17 }
 0xeaa   : > { %v1739_v57 = vadd.f32 %v2076_v55, %v1900_v48 }
 0xeab   : > { %v1738_v58 = vadd.f32 %v2077_v56, %v1900_v48 }
 0xeac   : > { %1744 = vst.msk [vmem:[%s402_s16 + $0x18] sm:$0xff] %vm1740_vm4, %v1739_v57 }
 0xead   : > { %1743 = vst.msk [vmem:[%s402_s16 + $0x10] sm:$0xff] %vm1740_vm4, %v1738_v58 }
 0xeae PF: > { %s22_s30 = sadd.s32 1, %s2329_s30  }
 0xeaf   : > { %p19_p6 = scmp.ge.s32.totalorder %s22_s30, 4  }
 0xeb1   :  { %21 = sbr.rel (!%p19_p6) target bundleno = 3 (0x3), region = 115 }
 0xeb8   :  { %1766 = vsyncpa [#allocation3], 1 }
 0xeb9   :  { %1768 = vsyncpa [#allocation3 + $0x1], 1 }
 0xeba   :  { %1769 = vsyncpa [#allocation5], 1 }
 0xebb   :  { %1770 = vsyncpa [#allocation8], 1 }

</bundles_post_ra>
